<compile_context>
chip_gen: v5e
topology: v5e:2x2
jax: 0.10.0
libtpu: 0.0.40
codegen_flags: <defaults>
</compile_context>

<pallas_src>
import jax
import jax.numpy as jnp
from jax.experimental import pallas as pl
from jax.experimental.pallas import tpu as pltpu


LANE = 128          # lane width / MXU native tile
TILE_N_MAX = 512    # row tile (fits comfortably in VMEM on v5e/v6e/v7x with padded dims)
NEG_PAD = -1e30     # bias value for padded output columns -> softmax prob ~ 0


def _round_up(x, m):
    return (x + m - 1) // m * m


def node_predictor_kernel(h_ref, w1_ref, b1_ref, w2_ref, b2_ref, o_ref):
    # h tile is bf16 (cast once in the wrapper to halve HBM traffic); weights are bf16.
    # MXU matmuls accumulate in f32; all elementwise math stays in f32.
    z1 = jnp.dot(h_ref[...], w1_ref[...],
                 preferred_element_type=jnp.float32) + b1_ref[...]
    a1 = jnp.maximum(z1, 0.0)

    z2 = jnp.dot(a1.astype(jnp.bfloat16), w2_ref[...],
                 preferred_element_type=jnp.float32) + b2_ref[...]
    # Padded output columns carry a -1e30 bias, so they vanish in the softmax below.

    m = jnp.max(z2, axis=-1, keepdims=True)
    e = jnp.exp(z2 - m)
    s = jnp.sum(e, axis=-1, keepdims=True)
    o_ref[...] = (e * pl.reciprocal(s, approx=True)).astype(o_ref.dtype)


def node_predictor(h, w1, b1, w2, b2):
    """h: (N, feat_dim); w1: (feat_dim, hidden); b1: (hidden,);
       w2: (hidden, out); b2: (out,). Returns (N, out) float32 softmax probs."""
    N, feat_dim = h.shape
    hidden_dim = w1.shape[1]
    out_dim = w2.shape[1]

    # Pad feature dims up to the 128-lane width; pad batch up to the row tile.
    f_pad = _round_up(feat_dim, LANE)
    h_pad = _round_up(hidden_dim, LANE)
    o_pad = _round_up(out_dim, LANE)
    tile_n = min(TILE_N_MAX, _round_up(N, 8))
    n_pad = _round_up(N, tile_n)

    # Activations / weights: zero padding keeps the math identical.
    # bf16 operands for the MXU (f32 accumulation happens in-kernel).
    hp = jnp.pad(h, ((0, n_pad - N), (0, f_pad - feat_dim))).astype(jnp.bfloat16)
    w1p = jnp.pad(w1, ((0, f_pad - feat_dim), (0, h_pad - hidden_dim))).astype(jnp.bfloat16)
    w2p = jnp.pad(w2, ((0, h_pad - hidden_dim), (0, o_pad - out_dim))).astype(jnp.bfloat16)

    # Biases stay f32, as (1, dim) rows. Padded hidden bias = 0 (-> ReLU kills it);
    # padded output bias = -1e30 so those logits get probability ~0 in the softmax.
    b1p = jnp.pad(b1.reshape(1, hidden_dim),
                  ((0, 0), (0, h_pad - hidden_dim))).astype(jnp.float32)
    b2p = jnp.pad(b2.reshape(1, out_dim),
                  ((0, 0), (0, o_pad - out_dim)),
                  constant_values=NEG_PAD).astype(jnp.float32)

    out_padded = pl.pallas_call(
        node_predictor_kernel,
        out_shape=jax.ShapeDtypeStruct((n_pad, o_pad), jnp.float32),
        grid=(n_pad // tile_n,),
        in_specs=[
            pl.BlockSpec((tile_n, f_pad), lambda i: (i, 0)),   # streamed h tiles
            pl.BlockSpec((f_pad, h_pad), lambda i: (0, 0)),    # resident weights
            pl.BlockSpec((1, h_pad), lambda i: (0, 0)),
            pl.BlockSpec((h_pad, o_pad), lambda i: (0, 0)),
            pl.BlockSpec((1, o_pad), lambda i: (0, 0)),
        ],
        out_specs=pl.BlockSpec((tile_n, o_pad), lambda i: (i, 0)),
        compiler_params=pltpu.CompilerParams(
            dimension_semantics=("parallel",),
        ),
    )(hp, w1p, b1p, w2p, b2p)

    return out_padded[:N, :out_dim]


def init_params(key, feat_dim, hidden_dim, out_dim):
    """Deterministic init mimicking nn.Linear default (uniform +/- 1/sqrt(fan_in))."""
    k1, k2, k3, k4 = jax.random.split(key, 4)
    bound1 = 1.0 / jnp.sqrt(feat_dim)
    bound2 = 1.0 / jnp.sqrt(hidden_dim)
    w1 = jax.random.uniform(k1, (feat_dim, hidden_dim), jnp.float32, -bound1, bound1)
    b1 = jax.random.uniform(k2, (hidden_dim,), jnp.float32, -bound1, bound1)
    w2 = jax.random.uniform(k3, (hidden_dim, out_dim), jnp.float32, -bound2, bound2)
    b2 = jax.random.uniform(k4, (out_dim,), jnp.float32, -bound2, bound2)
    return w1, b1, w2, b2


if __name__ == "__main__":
    # Small shapes consistent with the module's forward: h is (N, feat_dim).
    N, feat_dim, hidden_dim, out_dim = 8, 32, 64, 16

    key = jax.random.PRNGKey(0)
    k_h, k_p = jax.random.split(key)
    h = jax.random.normal(k_h, (N, feat_dim), dtype=jnp.float32)
    w1, b1, w2, b2 = init_params(k_p, feat_dim, hidden_dim, out_dim)

    out = node_predictor(h, w1, b1, w2, b2)
    out = jax.block_until_ready(out)

    # Pure-JAX f32 reference of the same forward (module semantics).
    z1 = jnp.maximum(h @ w1 + b1, 0.0)
    z2 = z1 @ w2 + b2
    ref = jax.nn.softmax(z2, axis=-1)

    assert out.shape == (N, out_dim)
    # bf16 MXU operands + approx reciprocal -> slightly looser tolerance than pure f32.
    assert jnp.allclose(out, ref, atol=2e-2, rtol=0.0), float(jnp.max(jnp.abs(out - ref)))
    assert jnp.allclose(jnp.sum(out, axis=-1), 1.0, atol=1e-2)
    assert bool(jnp.all(jnp.isfinite(out)))

    print("KERNEL_OK")
</pallas_src>

<mosaic_0001>
module attributes {stable_mosaic.version = 11 : i64} {
  func.func @node_predictor_kernel(%arg0: i32, %arg1: memref<8x128xbf16, #tpu.memory_space<vmem>>, %arg2: memref<128x128xbf16, #tpu.memory_space<vmem>>, %arg3: memref<1x128xf32, #tpu.memory_space<vmem>>, %arg4: memref<128x128xbf16, #tpu.memory_space<vmem>>, %arg5: memref<1x128xf32, #tpu.memory_space<vmem>>, %arg6: memref<8x128xf32, #tpu.memory_space<vmem>>) attributes {dimension_semantics = [#tpu.dimension_semantics<parallel>], iteration_bounds = array<i64: 1>, scalar_prefetch = 0 : i64, scratch_operands = 0 : i64, tpu.core_type = #tpu.core_type<tc>, window_params = [{transform_indices = @transform_0, window_bounds = array<i64: 8, 128>}, {pipeline_mode = #tpu.pipeline_mode<synchronous>, transform_indices = @transform_1, window_bounds = array<i64: 128, 128>}, {pipeline_mode = #tpu.pipeline_mode<synchronous>, transform_indices = @transform_2, window_bounds = array<i64: 1, 128>}, {pipeline_mode = #tpu.pipeline_mode<synchronous>, transform_indices = @transform_3, window_bounds = array<i64: 128, 128>}, {pipeline_mode = #tpu.pipeline_mode<synchronous>, transform_indices = @transform_4, window_bounds = array<i64: 1, 128>}, {transform_indices = @transform_5, window_bounds = array<i64: 8, 128>}]} {
    %c0 = arith.constant 0 : index
    %c0_0 = arith.constant 0 : index
    %0 = vector.load %arg1[%c0, %c0_0] : memref<8x128xbf16, #tpu.memory_space<vmem>>, vector<8x128xbf16>
    %c0_1 = arith.constant 0 : index
    %c0_2 = arith.constant 0 : index
    %1 = vector.load %arg2[%c0_1, %c0_2] : memref<128x128xbf16, #tpu.memory_space<vmem>>, vector<128x128xbf16>
    %cst = arith.constant dense<0.000000e+00> : vector<8x128xf32>
    %2 = tpu.matmul %0, %1, %cst {dimension_numbers = #tpu.dot_dimension_numbers<[1], [0], [0], [1], [0, 0, 1, 1], [], []>} : vector<8x128xbf16>, vector<128x128xbf16>, vector<8x128xf32> -> vector<8x128xf32>
    %c0_3 = arith.constant 0 : index
    %c0_4 = arith.constant 0 : index
    %3 = vector.load %arg3[%c0_3, %c0_4] : memref<1x128xf32, #tpu.memory_space<vmem>>, vector<1x128xf32>
    %4 = vector.broadcast %3 : vector<1x128xf32> to vector<8x128xf32>
    %5 = arith.addf %2, %4 : vector<8x128xf32>
    %cst_5 = arith.constant 0.000000e+00 : f32
    %6 = vector.broadcast %cst_5 : f32 to vector<8x128xf32>
    %7 = arith.maximumf %5, %6 : vector<8x128xf32>
    %8 = arith.truncf %7 : vector<8x128xf32> to vector<8x128xbf16>
    %c0_6 = arith.constant 0 : index
    %c0_7 = arith.constant 0 : index
    %9 = vector.load %arg4[%c0_6, %c0_7] : memref<128x128xbf16, #tpu.memory_space<vmem>>, vector<128x128xbf16>
    %cst_8 = arith.constant dense<0.000000e+00> : vector<8x128xf32>
    %10 = tpu.matmul %8, %9, %cst_8 {dimension_numbers = #tpu.dot_dimension_numbers<[1], [0], [0], [1], [0, 0, 1, 1], [], []>} : vector<8x128xbf16>, vector<128x128xbf16>, vector<8x128xf32> -> vector<8x128xf32>
    %c0_9 = arith.constant 0 : index
    %c0_10 = arith.constant 0 : index
    %11 = vector.load %arg5[%c0_9, %c0_10] : memref<1x128xf32, #tpu.memory_space<vmem>>, vector<1x128xf32>
    %12 = vector.broadcast %11 : vector<1x128xf32> to vector<8x128xf32>
    %13 = arith.addf %10, %12 : vector<8x128xf32>
    %cst_11 = arith.constant dense<0xFF800000> : vector<8xf32>
    %14 = vector.multi_reduction <maximumf>, %13, %cst_11 [1] : vector<8x128xf32> to vector<8xf32>
    %15 = vector.shape_cast %14 : vector<8xf32> to vector<8x1xf32>
    %16 = vector.broadcast %15 : vector<8x1xf32> to vector<8x128xf32>
    %17 = arith.subf %13, %16 : vector<8x128xf32>
    %18 = math.exp %17 : vector<8x128xf32>
    %cst_12 = arith.constant dense<0.000000e+00> : vector<8xf32>
    %19 = vector.multi_reduction <add>, %18, %cst_12 [1] : vector<8x128xf32> to vector<8xf32>
    %20 = vector.shape_cast %19 : vector<8xf32> to vector<8x1xf32>
    %21 = tpu.reciprocal %20 {approx = true} : vector<8x1xf32> -> vector<8x1xf32>
    %22 = vector.broadcast %21 : vector<8x1xf32> to vector<8x128xf32>
    %23 = arith.mulf %18, %22 : vector<8x128xf32>
    %c0_13 = arith.constant 0 : index
    %c0_14 = arith.constant 0 : index
    %24 = vector.load %arg6[%c0_13, %c0_14] : memref<8x128xf32, #tpu.memory_space<vmem>>, vector<8x128xf32>
    tpu.vector_store %arg6[%c0_13, %c0_14], %23 {strides = array<i32>} : memref<8x128xf32, #tpu.memory_space<vmem>>, vector<8x128xf32>,
    return
  }
  func.func @transform_0(%arg0: i32) -> (i32, i32) {
    %c0_i32 = arith.constant 0 : i32
    %c0_i32_0 = arith.constant 0 : i32
    return %arg0, %c0_i32 : i32, i32
  }
  func.func @transform_1(%arg0: i32) -> (i32, i32) {
    %c0_i32 = arith.constant 0 : i32
    %c0_i32_0 = arith.constant 0 : i32
    %c0_i32_1 = arith.constant 0 : i32
    return %c0_i32, %c0_i32_0 : i32, i32
  }
  func.func @transform_2(%arg0: i32) -> (i32, i32) {
    %c0_i32 = arith.constant 0 : i32
    %c0_i32_0 = arith.constant 0 : i32
    %c0_i32_1 = arith.constant 0 : i32
    return %c0_i32, %c0_i32_0 : i32, i32
  }
  func.func @transform_3(%arg0: i32) -> (i32, i32) {
    %c0_i32 = arith.constant 0 : i32
    %c0_i32_0 = arith.constant 0 : i32
    %c0_i32_1 = arith.constant 0 : i32
    return %c0_i32, %c0_i32_0 : i32, i32
  }
  func.func @transform_4(%arg0: i32) -> (i32, i32) {
    %c0_i32 = arith.constant 0 : i32
    %c0_i32_0 = arith.constant 0 : i32
    %c0_i32_1 = arith.constant 0 : i32
    return %c0_i32, %c0_i32_0 : i32, i32
  }
  func.func @transform_5(%arg0: i32) -> (i32, i32) {
    %c0_i32 = arith.constant 0 : i32
    %c0_i32_0 = arith.constant 0 : i32
    return %arg0, %c0_i32 : i32, i32
  }
}

</mosaic_0001>

<bundles_post_ra>
// kernel: tpu_custom_call.1
= control target key start
LH: loop header
LB: loop body
LE: loop exit
PB: predicated region body
PF: predicated region fallthrough
CT: control target
= control target key end

     0   :  { %10 = vsyncpa [#allocation3], 0  ;;  %s507_s0 = inlined_call_operand.hbm [shape: bf16[8,128], index: 0, kind: input, shape index: {}]   ;;  %s508_s1 = inlined_call_operand.hbm [shape: bf16[128,128], index: 1, kind: input, shape index: {}]   ;;  %s509_s2 = inlined_call_operand.vmem [shape: f32[1,128], index: 2, kind: input, shape index: {}]   ;;  %s510_s3 = inlined_call_operand.hbm [shape: bf16[128,128], index: 3, kind: input, shape index: {}]   ;;  %s511_s4 = inlined_call_operand.vmem [shape: f32[1,128], index: 4, kind: input, shape index: {}]   ;;  %s512_s5 = inlined_call_operand.hbm [shape: f32[8,128], index: 5, kind: output, shape index: {}]  }
   0x1   :  { %11 = vsyncpa [#allocation6], 0  ;;  %s28_s20 = sshll.u32 %s508_s1, 4  ;;  %s29_s20 = int_to_ptr.hbm [resolvable:$true] %s28_s20 }
   0x2   :  { %12 = vsyncpa [#allocation4], 0  ;;  %s453_s21 = smov [#allocation5]   ;;  %s18_s25 = sshll.u32 %s507_s0, 4  ;;  %s19_s25 = int_to_ptr.hbm [resolvable:$true] %s18_s25 }
   0x3   :  { %s30_s22 = sshll.u32 %s453_s21, 4  ;;  %s454_s26 = smov 64   ;;  %s31_s22 = int_to_ptr.vmem [resolvable:$true] %s30_s22 }
   0x4   :  { %s455_s27 = smov 4   ;;  %s456_s28 = smov [#allocation2]  }
   0x5   :  { %36 = dma.hbm_to_vmem [thread:$0]  %s29_s20, 1024, %s31_s22, [#allocation6], %s454_s26, %s454_s26, %s455_s27  }
   0x6   :  { %s20_s29 = sshll.u32 %s456_s28, 4  ;;  %s43_s7 = sshll.u32 %s510_s3, 4  ;;  %s21_s29 = int_to_ptr.vmem [resolvable:$true] %s20_s29  ;;  %s44_s7 = int_to_ptr.hbm [resolvable:$true] %s43_s7 }
   0x7   :  { %23 = dma.hbm_to_vmem [thread:$0]  %s19_s25, 64, %s21_s29, [#allocation3]  }
   0x8   :  { %s457_s1 = smov [#allocation7]  }
   0x9   :  { %s45_s8 = sshll.u32 %s457_s1, 4  ;;  %s46_s8 = int_to_ptr.vmem [resolvable:$true] %s45_s8 }
   0xa   :  { %51 = dma.hbm_to_vmem [thread:$0]  %s44_s7, 1024, %s46_s8, [#allocation6], %s454_s26, %s454_s26, %s455_s27  }
   0xb   :  { %447 = dma.done.wait [#allocation3], 64  }
   0xc   :  { %448 = vsyncadd [#allocation3], 4294967232 }
   0xd   :  { %449 = dma.done.wait [#allocation6], 2048  }
   0xe   :  { %450 = vsyncadd [#allocation6], 4294965248  ;;  %v330_v0 = vld [vmem:[#allocation5 + $0x38] sm:$0xff]  ;;  %v329_v1 = vld [vmem:[#allocation5 + $0x30] sm:$0xff]  ;;  %s248_s14 = sshll.u32 %s512_s5, 4  ;;  %s249_s14 = int_to_ptr.hbm [resolvable:$true] %s248_s14 }
   0xf   :  { %135 = vmatpush.bf16.msra.mxu0 %v330_v0  ;;  %v338_v2 = vld [vmem:[#allocation7 + $0x38] sm:$0xff]  ;;  %v337_v3 = vld [vmem:[#allocation7 + $0x30] sm:$0xff]  ;;  %v328_v4 = vld [vmem:[#allocation5 + $0x28] sm:$0xff] }
  0x10   :  { %218 = vmatpush.bf16.msra.mxu1 %v338_v2  ;;  %v336_v5 = vld [vmem:[#allocation7 + $0x28] sm:$0xff]  ;;  %v327_v6 = vld [vmem:[#allocation5 + $0x20] sm:$0xff]  ;;  %v326_v8 = vld [vmem:[#allocation5 + $0x18] sm:$0xff] }
  0x11   :  { %v335_v7 = vld [vmem:[#allocation7 + $0x20] sm:$0xff]  ;;  %v334_v9 = vld [vmem:[#allocation7 + $0x18] sm:$0xff]  ;;  %v325_v10 = vld [vmem:[#allocation5 + $0x10] sm:$0xff] }
  0x12   :  { %v333_v11 = vld [vmem:[#allocation7 + $0x10] sm:$0xff]  ;;  %v324_v12 = vld [vmem:[#allocation5 + $0x8] sm:$0xff]  ;;  %v323_v13 = vld [vmem:[#allocation5] sm:$0xff] }
  0x13   :  { %136 = vmatpush.bf16.msra.mxu0 %v329_v1  ;;  %v66_v14 = vld [vmem:[#allocation2] sm:$0xf]  ;;  %v332_v15 = vld [vmem:[#allocation7 + $0x8] sm:$0xff]  ;;  %v331_v16 = vld [vmem:[#allocation7] sm:$0xff] }
  0x14   :  { %219 = vmatpush.bf16.msra.mxu1 %v337_v3  ;;  %v345_v17 = vld [vmem:[%s509_s2] ss:$0 sm:$0xff]  ;;  %s458_s2 = smov [#allocation8]  }
  0x15   :  { %v346_v23 = vld [vmem:[%s511_s4] ss:$0 sm:$0xff]  ;;  %s246_s11 = sshll.u32 %s458_s2, 4  ;;  %s247_s11 = int_to_ptr.vmem [resolvable:$true] %s246_s11 }
  0x17   :  { %137 = vmatpush.bf16.msra.mxu0 %v328_v4 }
  0x18   :  { %220 = vmatpush.bf16.msra.mxu1 %v336_v5 }
  0x1b   :  { %138 = vmatpush.bf16.msra.mxu0 %v327_v6 }
  0x1c   :  { %221 = vmatpush.bf16.msra.mxu1 %v335_v7 }
  0x1f   :  { %139 = vmatpush.bf16.msra.mxu0 %v326_v8 }
  0x20   :  { %222 = vmatpush.bf16.msra.mxu1 %v334_v9 }
  0x23   :  { %140 = vmatpush.bf16.msra.mxu0 %v325_v10 }
  0x24   :  { %223 = vmatpush.bf16.msra.mxu1 %v333_v11 }
  0x27   :  { %141 = vmatpush.bf16.msra.mxu0 %v324_v12 }
  0x28   :  { %224 = vmatpush.bf16.msra.mxu1 %v332_v15 }
  0x2b   :  { %142 = vmatpush.bf16.msra.mxu0 %v323_v13 }
  0x2c   :  { %225 = vmatpush.bf16.msra.mxu1 %v331_v16 }
  0x2e   :  { %143 = vmatmul.bf16.vlgmr.msra.gmra.mxu0 %v66_v14 }
  0xab   :  { %v144_v18 = vpop.f32.mrf.mxu0 }
  0xac   :  { %v145_v19 = vadd.f32 %v345_v17, %v144_v18 }
  0xae   :  { %v148_v20 = vmax.f32 %v145_v19, 0.0 }
  0xb0   :  { %v149_v21 = vpack.c.bf16 %v148_v20, %v148_v20 }
  0xb2   :  { %226 = vmatmul.bf16.vlgmr.msra.gmra.mxu1 %v149_v21 }
  0xb3   :  { %v146_v22 = vpop.f32.mrf.mxu0 }
 0x12f   :  { %v227_v24 = vpop.f32.mrf.mxu1 }
 0x130   :  { %v228_v25 = vadd.f32 %v346_v23, %v227_v24 }
 0x132   :  { %231 = vmax.xlane.f32.xlu0 %v228_v25 }
 0x137   :  { %v229_v26 = vpop.f32.mrf.mxu1 }
 0x1a5   :  { %v232_v27 = vpop.xlane.xlu0 %231 }
 0x1a6   :  { %v233_v28 = vsub.f32 %v228_v25, %v232_v27 }
 0x1a8   :  { %v234_v29 = vmul.f32 1.442695, %v233_v28 }
 0x1aa   :  { %347 = vpow2.f32 %v234_v29 }
 0x1b0   :  { %v348_v30 = vpop.eup %347 }
 0x1b1   :  { %236 = vadd.xlane.f32.xlu0 %v348_v30 }
 0x224   :  { %v237_v31 = vpop.xlane.xlu0 %236 }
 0x225   :  { %349 = vrcp.f32 %v237_v31 }
 0x22b   :  { %v350_v32 = vpop.eup %349 }
 0x22c   :  { %v239_v33 = vmul.f32 %v350_v32, %v348_v30 }
 0x22e   :  { %240 = vst [vmem:[#allocation8] sm:$0xff] %v239_v33 }
 0x22f   :  { %251 = dma.vmem_to_hbm [thread:$0]  %s247_s11, 128, %s249_s14, [#allocation4]  }
 0x230   :  { %451 = dma.done.wait [#allocation4], 128  }
 0x231   :  { %452 = vsyncadd [#allocation4], 4294967168 }
 0x232   :  { %256 = vsyncpa [#allocation3], 1 }
 0x233   :  { %257 = vsyncpa [#allocation6], 1 }
 0x234   :  { %258 = vsyncpa [#allocation4], 1 }

</bundles_post_ra>
